<compile_context>
chip_gen: v5e
topology: v5e:2x2
jax: 0.10.0
libtpu: 0.0.40
codegen_flags: <defaults>
</compile_context>

<pallas_src>
import functools

import jax
import jax.numpy as jnp
from jax import lax
from jax.experimental import pallas as pl
from jax.experimental.pallas import tpu as pltpu


def _round_up(x, m):
    return (x + m - 1) // m * m


def _dwconv_kernel(w_ref, b_ref, m_ref, x_ref, o_ref, *, K, pad, W, L, tc, cg):
    """One (batch, channel-block) grid step of the depthwise 'same' conv.

    w_ref : (tc, K*K) f32 VMEM   per-channel taps of this channel block
    b_ref : (tc, 1)   f32 VMEM   per-channel bias
    m_ref : (K*K, L)  f32 VMEM   0/1 zero-padding validity mask per tap
    x_ref : (tc, L)        VMEM  input, (H, W) flattened onto lanes
    o_ref : (tc, L)        VMEM  output, same flat layout
    """
    KK = K * K
    n_groups = tc // cg

    def one_group(g, carry):
        start = pl.multiple_of(g * cg, cg)
        xg = x_ref[pl.ds(start, cg), :].astype(jnp.float32)            # (cg, L)
        wg = w_ref[pl.ds(start, cg), :]                                # (cg, KK)
        # Accumulator lives in vregs; initialized with the bias (no extra pass).
        acc = jnp.broadcast_to(b_ref[pl.ds(start, cg), :], (cg, L))    # (cg, L) f32
        for t in range(KK):                                            # static K*K tap unroll
            kh, kw = divmod(t, K)
            d = (kh - pad) * W + (kw - pad)                            # flat shift of this tap
            # rolled[o] = xg[(o + d) mod L]; wrapped / out-of-image positions are
            # zeroed by the tap mask, which implements the conv zero padding.
            rolled = xg if d == 0 else pltpu.roll(xg, shift=(-d) % L, axis=1)
            mask = m_ref[t:t + 1, :]                                   # (1, L) 0/1
            acc = acc + (rolled * mask) * wg[:, t:t + 1]
        o_ref[pl.ds(start, cg), :] = acc.astype(o_ref.dtype)           # one lane-dense store
        return carry

    # Modest unroll only: the 49-tap body is already large (feedback item).
    lax.fori_loop(0, n_groups, one_group, 0,
                  unroll=(2 if (n_groups > 1 and n_groups % 2 == 0) else 1))


def _tap_masks(H, W, K, pad, dtype=jnp.float32):
    """(K*K, H*W) table of 0/1 validity masks, one per tap (implements zero pad)."""
    pos = jnp.arange(H * W, dtype=jnp.int32)
    row = pos // W
    col = pos % W
    rows = []
    for kh in range(K):
        dh = kh - pad
        rv = (row >= max(0, -dh)) & (row < min(H, H - dh))
        for kw in range(K):
            dw = kw - pad
            cv = (col >= max(0, -dw)) & (col < min(W, W - dw))
            rows.append((rv & cv).astype(dtype))
    return jnp.stack(rows, axis=0)


def _pick_channel_tile(B, C, L, in_itemsize, out_itemsize, *,
                       vmem_budget_bytes=8 << 20, min_steps=8):
    """Channel tile: a multiple-of-8 divisor of C whose *padded*, double-buffered
    in+out pipeline footprint fits the budget, preferring the largest tile that
    still leaves >= min_steps grid steps (pipelining + megacore / v7x 2 TCs)."""
    lane = _round_up(L, 128)

    def pipeline_bytes(tc):
        tcp = _round_up(tc, 8)
        return 2 * tcp * lane * (in_itemsize + out_itemsize)   # 2 buffers x (in + out)

    cands = [d for d in range(8, C + 1, 8) if C % d == 0]
    if not cands:
        return C                                               # C < 8 / no mult-of-8 divisor
    fitting = [d for d in cands if pipeline_bytes(d) <= vmem_budget_bytes] or [min(cands)]
    enough = [d for d in fitting if B * (C // d) >= min_steps]
    return max(enough) if enough else min(fitting)


def dwconv2d(x_nchw, weight, bias, *, stride=1, padding=0):
    """Matches nn.Conv2d(dim, dim, K, stride, padding, groups=dim) on NCHW input.

    Pallas path covers the configuration MSAA actually uses: stride=1 with
    'same' padding (2*padding == K-1), e.g. DWConv2d(dim, 7, 1, 3).
    """
    B, C, H, W = x_nchw.shape
    K = int(weight.shape[-1])
    assert weight.shape == (C, 1, K, K), weight.shape
    assert bias.shape == (C,), bias.shape
    if stride != 1 or 2 * padding != K - 1:
        # TODO(synk): general stride / padding (unused by MSAA's DWConv2d(dim, 7, 1, 3)).
        raise NotImplementedError("Pallas DWConv2d path covers stride=1 'same' padding only")

    L = H * W
    KK = K * K
    in_itemsize = jnp.dtype(x_nchw.dtype).itemsize
    tc = _pick_channel_tile(B, C, L, in_itemsize, in_itemsize)
    cg = 8 if tc % 8 == 0 else tc              # channels per vreg-resident group

    w2 = weight.reshape(C, KK).astype(jnp.float32)
    b2 = bias.reshape(C, 1).astype(jnp.float32)
    masks = _tap_masks(H, W, K, padding)
    x_flat = x_nchw.reshape(B, C, L)           # free reshape, no transpose

    kernel = functools.partial(_dwconv_kernel,
                               K=K, pad=padding, W=W, L=L, tc=tc, cg=cg)

    cost = pl.CostEstimate(
        flops=2 * B * C * L * KK,
        transcendentals=0,
        bytes_accessed=2 * B * C * L * in_itemsize + (C * KK + C + KK * L) * 4,
    )

    out_flat = pl.pallas_call(
        kernel,
        out_shape=jax.ShapeDtypeStruct((B, C, L), x_nchw.dtype),
        grid=(B, C // tc),
        in_specs=[
            pl.BlockSpec((tc, KK), lambda b, cb: (cb, 0)),          # per-block weights
            pl.BlockSpec((tc, 1), lambda b, cb: (cb, 0)),           # per-block bias
            pl.BlockSpec((KK, L), lambda b, cb: (0, 0)),            # tap masks (fetched once)
            pl.BlockSpec((None, tc, L), lambda b, cb: (b, cb, 0)),  # input
        ],
        out_specs=pl.BlockSpec((None, tc, L), lambda b, cb: (b, cb, 0)),
        compiler_params=pltpu.CompilerParams(
            dimension_semantics=("parallel", "parallel"),
            vmem_limit_bytes=32 * 1024 * 1024,
        ),
        cost_estimate=cost,
    )(w2, b2, masks, x_flat)

    return out_flat.reshape(B, C, H, W)


def _reference_dwconv(x_nchw, weight, bias, *, stride, padding):
    """Pure-JAX grouped-conv reference (== nn.Conv2d(groups=dim))."""
    C = x_nchw.shape[1]
    out = lax.conv_general_dilated(
        x_nchw, weight,
        window_strides=(stride, stride),
        padding=((padding, padding), (padding, padding)),
        dimension_numbers=("NCHW", "OIHW", "NCHW"),
        feature_group_count=C,
    )
    return out + bias.reshape(1, C, 1, 1)


if __name__ == "__main__":
    key = jax.random.PRNGKey(0)

    configs = [
        # (B, dim, H, W, K, padding) — all 'same' stride-1, as MSAA uses
        (2, 4, 16, 16, 3, 1),      # small generic case
        (1, 8, 16, 16, 7, 3),      # MSA's DWConv2d config (k=7, s=1, p=3), small dim
        (1, 128, 16, 16, 7, 3),    # wider dim: exercises channel tiling + group loop
    ]

    for i, (B, dim, H, W, K, p) in enumerate(configs):
        key, kx, kw, kb = jax.random.split(key, 4)
        # PyTorch Conv2d-style init: uniform(+/- 1/sqrt(fan_in)), fan_in = 1*K*K.
        bound = 1.0 / float(K * K) ** 0.5
        weight = jax.random.uniform(kw, (dim, 1, K, K), jnp.float32, -bound, bound)
        bias = jax.random.uniform(kb, (dim,), jnp.float32, -bound, bound)
        x = jax.random.normal(kx, (B, dim, H, W), dtype=jnp.float32)

        out = jax.block_until_ready(dwconv2d(x, weight, bias, stride=1, padding=p))
        ref = _reference_dwconv(x, weight, bias, stride=1, padding=p)
        assert out.shape == ref.shape, (i, out.shape, ref.shape)
        assert jnp.allclose(out, ref, atol=1e-4, rtol=1e-4), f"mismatch in config {i}"

    print("KERNEL_OK")
</pallas_src>

<mosaic_0001>
module attributes {stable_mosaic.version = 11 : i64} {
  func.func @_dwconv_kernel(%arg0: i32, %arg1: i32, %arg2: memref<4x9xf32, #tpu.memory_space<vmem>>, %arg3: memref<4x1xf32, #tpu.memory_space<vmem>>, %arg4: memref<9x256xf32, #tpu.memory_space<vmem>>, %arg5: memref<1x4x256xf32, #tpu.memory_space<vmem>>, %arg6: memref<1x4x256xf32, #tpu.memory_space<vmem>>) attributes {dimension_semantics = [#tpu.dimension_semantics<parallel>, #tpu.dimension_semantics<parallel>], iteration_bounds = array<i64: 2, 1>, scalar_prefetch = 0 : i64, scratch_operands = 0 : i64, tpu.core_type = #tpu.core_type<tc>, window_params = [{transform_indices = @transform_0, window_bounds = array<i64: 4, 9>}, {transform_indices = @transform_1, window_bounds = array<i64: 4, 1>}, {pipeline_mode = #tpu.pipeline_mode<synchronous>, transform_indices = @transform_2, window_bounds = array<i64: 9, 256>}, {transform_indices = @transform_3, window_bounds = array<i64: 1, 4, 256>}, {transform_indices = @transform_4, window_bounds = array<i64: 1, 4, 256>}]} {
    %c0_i32 = arith.constant 0 : i32
    %c4_i32 = arith.constant 4 : i32
    %0 = arith.muli %c0_i32, %c4_i32 : i32
    %1 = tpu.assume_multiple %0, 4 : i32
    %c0 = arith.constant 0 : index
    %2 = arith.index_cast %1 : i32 to index
    %c0_0 = arith.constant 0 : index
    %3 = vector.load %arg5[%c0, %2, %c0_0] : memref<1x4x256xf32, #tpu.memory_space<vmem>>, vector<1x4x256xf32>
    %4 = vector.shape_cast %3 : vector<1x4x256xf32> to vector<4x256xf32>
    %5 = arith.index_cast %1 : i32 to index
    %c0_1 = arith.constant 0 : index
    %6 = vector.load %arg2[%5, %c0_1] : memref<4x9xf32, #tpu.memory_space<vmem>>, vector<4x9xf32>
    %7 = arith.index_cast %1 : i32 to index
    %c0_2 = arith.constant 0 : index
    %8 = vector.load %arg3[%7, %c0_2] : memref<4x1xf32, #tpu.memory_space<vmem>>, vector<4x1xf32>
    %9 = vector.shape_cast %8 : vector<4x1xf32> to vector<4x1xf32>
    %10 = vector.broadcast %9 : vector<4x1xf32> to vector<4x256xf32>
    %c17_i32 = arith.constant 17 : i32
    %11 = tpu.dynamic_rotate %4 by %c17_i32 dim 1 : vector<4x256xf32>, i32 -> vector<4x256xf32>
    %c0_3 = arith.constant 0 : index
    %c0_4 = arith.constant 0 : index
    %12 = vector.load %arg4[%c0_3, %c0_4] : memref<9x256xf32, #tpu.memory_space<vmem>>, vector<1x256xf32>
    %13 = vector.broadcast %12 : vector<1x256xf32> to vector<4x256xf32>
    %14 = arith.mulf %11, %13 : vector<4x256xf32>
    %15 = vector.extract_strided_slice %6 {offsets = [0, 0], sizes = [4, 1], strides = [1, 1]} : vector<4x9xf32> to vector<4x1xf32>
    %16 = vector.broadcast %15 : vector<4x1xf32> to vector<4x256xf32>
    %17 = arith.mulf %14, %16 : vector<4x256xf32>
    %18 = arith.addf %10, %17 : vector<4x256xf32>
    %c16_i32 = arith.constant 16 : i32
    %19 = tpu.dynamic_rotate %4 by %c16_i32 dim 1 : vector<4x256xf32>, i32 -> vector<4x256xf32>
    %c1 = arith.constant 1 : index
    %c0_5 = arith.constant 0 : index
    %20 = vector.load %arg4[%c1, %c0_5] : memref<9x256xf32, #tpu.memory_space<vmem>>, vector<1x256xf32>
    %21 = vector.broadcast %20 : vector<1x256xf32> to vector<4x256xf32>
    %22 = arith.mulf %19, %21 : vector<4x256xf32>
    %23 = vector.extract_strided_slice %6 {offsets = [0, 1], sizes = [4, 1], strides = [1, 1]} : vector<4x9xf32> to vector<4x1xf32>
    %24 = vector.broadcast %23 : vector<4x1xf32> to vector<4x256xf32>
    %25 = arith.mulf %22, %24 : vector<4x256xf32>
    %26 = arith.addf %18, %25 : vector<4x256xf32>
    %c15_i32 = arith.constant 15 : i32
    %27 = tpu.dynamic_rotate %4 by %c15_i32 dim 1 : vector<4x256xf32>, i32 -> vector<4x256xf32>
    %c2 = arith.constant 2 : index
    %c0_6 = arith.constant 0 : index
    %28 = vector.load %arg4[%c2, %c0_6] : memref<9x256xf32, #tpu.memory_space<vmem>>, vector<1x256xf32>
    %29 = vector.broadcast %28 : vector<1x256xf32> to vector<4x256xf32>
    %30 = arith.mulf %27, %29 : vector<4x256xf32>
    %31 = vector.extract_strided_slice %6 {offsets = [0, 2], sizes = [4, 1], strides = [1, 1]} : vector<4x9xf32> to vector<4x1xf32>
    %32 = vector.broadcast %31 : vector<4x1xf32> to vector<4x256xf32>
    %33 = arith.mulf %30, %32 : vector<4x256xf32>
    %34 = arith.addf %26, %33 : vector<4x256xf32>
    %c1_i32 = arith.constant 1 : i32
    %35 = tpu.dynamic_rotate %4 by %c1_i32 dim 1 : vector<4x256xf32>, i32 -> vector<4x256xf32>
    %c3 = arith.constant 3 : index
    %c0_7 = arith.constant 0 : index
    %36 = vector.load %arg4[%c3, %c0_7] : memref<9x256xf32, #tpu.memory_space<vmem>>, vector<1x256xf32>
    %37 = vector.broadcast %36 : vector<1x256xf32> to vector<4x256xf32>
    %38 = arith.mulf %35, %37 : vector<4x256xf32>
    %39 = vector.extract_strided_slice %6 {offsets = [0, 3], sizes = [4, 1], strides = [1, 1]} : vector<4x9xf32> to vector<4x1xf32>
    %40 = vector.broadcast %39 : vector<4x1xf32> to vector<4x256xf32>
    %41 = arith.mulf %38, %40 : vector<4x256xf32>
    %42 = arith.addf %34, %41 : vector<4x256xf32>
    %c4 = arith.constant 4 : index
    %c0_8 = arith.constant 0 : index
    %43 = vector.load %arg4[%c4, %c0_8] : memref<9x256xf32, #tpu.memory_space<vmem>>, vector<1x256xf32>
    %44 = vector.broadcast %43 : vector<1x256xf32> to vector<4x256xf32>
    %45 = arith.mulf %4, %44 : vector<4x256xf32>
    %46 = vector.extract_strided_slice %6 {offsets = [0, 4], sizes = [4, 1], strides = [1, 1]} : vector<4x9xf32> to vector<4x1xf32>
    %47 = vector.broadcast %46 : vector<4x1xf32> to vector<4x256xf32>
    %48 = arith.mulf %45, %47 : vector<4x256xf32>
    %49 = arith.addf %42, %48 : vector<4x256xf32>
    %c255_i32 = arith.constant 255 : i32
    %50 = tpu.dynamic_rotate %4 by %c255_i32 dim 1 : vector<4x256xf32>, i32 -> vector<4x256xf32>
    %c5 = arith.constant 5 : index
    %c0_9 = arith.constant 0 : index
    %51 = vector.load %arg4[%c5, %c0_9] : memref<9x256xf32, #tpu.memory_space<vmem>>, vector<1x256xf32>
    %52 = vector.broadcast %51 : vector<1x256xf32> to vector<4x256xf32>
    %53 = arith.mulf %50, %52 : vector<4x256xf32>
    %54 = vector.extract_strided_slice %6 {offsets = [0, 5], sizes = [4, 1], strides = [1, 1]} : vector<4x9xf32> to vector<4x1xf32>
    %55 = vector.broadcast %54 : vector<4x1xf32> to vector<4x256xf32>
    %56 = arith.mulf %53, %55 : vector<4x256xf32>
    %57 = arith.addf %49, %56 : vector<4x256xf32>
    %c241_i32 = arith.constant 241 : i32
    %58 = tpu.dynamic_rotate %4 by %c241_i32 dim 1 : vector<4x256xf32>, i32 -> vector<4x256xf32>
    %c6 = arith.constant 6 : index
    %c0_10 = arith.constant 0 : index
    %59 = vector.load %arg4[%c6, %c0_10] : memref<9x256xf32, #tpu.memory_space<vmem>>, vector<1x256xf32>
    %60 = vector.broadcast %59 : vector<1x256xf32> to vector<4x256xf32>
    %61 = arith.mulf %58, %60 : vector<4x256xf32>
    %62 = vector.extract_strided_slice %6 {offsets = [0, 6], sizes = [4, 1], strides = [1, 1]} : vector<4x9xf32> to vector<4x1xf32>
    %63 = vector.broadcast %62 : vector<4x1xf32> to vector<4x256xf32>
    %64 = arith.mulf %61, %63 : vector<4x256xf32>
    %65 = arith.addf %57, %64 : vector<4x256xf32>
    %c240_i32 = arith.constant 240 : i32
    %66 = tpu.dynamic_rotate %4 by %c240_i32 dim 1 : vector<4x256xf32>, i32 -> vector<4x256xf32>
    %c7 = arith.constant 7 : index
    %c0_11 = arith.constant 0 : index
    %67 = vector.load %arg4[%c7, %c0_11] : memref<9x256xf32, #tpu.memory_space<vmem>>, vector<1x256xf32>
    %68 = vector.broadcast %67 : vector<1x256xf32> to vector<4x256xf32>
    %69 = arith.mulf %66, %68 : vector<4x256xf32>
    %70 = vector.extract_strided_slice %6 {offsets = [0, 7], sizes = [4, 1], strides = [1, 1]} : vector<4x9xf32> to vector<4x1xf32>
    %71 = vector.broadcast %70 : vector<4x1xf32> to vector<4x256xf32>
    %72 = arith.mulf %69, %71 : vector<4x256xf32>
    %73 = arith.addf %65, %72 : vector<4x256xf32>
    %c239_i32 = arith.constant 239 : i32
    %74 = tpu.dynamic_rotate %4 by %c239_i32 dim 1 : vector<4x256xf32>, i32 -> vector<4x256xf32>
    %c8 = arith.constant 8 : index
    %c0_12 = arith.constant 0 : index
    %75 = vector.load %arg4[%c8, %c0_12] : memref<9x256xf32, #tpu.memory_space<vmem>>, vector<1x256xf32>
    %76 = vector.broadcast %75 : vector<1x256xf32> to vector<4x256xf32>
    %77 = arith.mulf %74, %76 : vector<4x256xf32>
    %78 = vector.extract_strided_slice %6 {offsets = [0, 8], sizes = [4, 1], strides = [1, 1]} : vector<4x9xf32> to vector<4x1xf32>
    %79 = vector.broadcast %78 : vector<4x1xf32> to vector<4x256xf32>
    %80 = arith.mulf %77, %79 : vector<4x256xf32>
    %81 = arith.addf %73, %80 : vector<4x256xf32>
    %c0_13 = arith.constant 0 : index
    %82 = arith.index_cast %1 : i32 to index
    %c0_14 = arith.constant 0 : index
    %83 = vector.load %arg6[%c0_13, %82, %c0_14] : memref<1x4x256xf32, #tpu.memory_space<vmem>>, vector<1x4x256xf32>
    %84 = vector.shape_cast %83 : vector<1x4x256xf32> to vector<4x256xf32>
    %85 = vector.shape_cast %81 : vector<4x256xf32> to vector<1x4x256xf32>
    tpu.vector_store %arg6[%c0_13, %82, %c0_14], %85 {strides = array<i32>} : memref<1x4x256xf32, #tpu.memory_space<vmem>>, vector<1x4x256xf32>,
    %c1_i32_15 = arith.constant 1 : i32
    return
  }
  func.func @transform_0(%arg0: i32, %arg1: i32) -> (i32, i32) {
    %c0_i32 = arith.constant 0 : i32
    %c0_i32_0 = arith.constant 0 : i32
    return %arg1, %c0_i32 : i32, i32
  }
  func.func @transform_1(%arg0: i32, %arg1: i32) -> (i32, i32) {
    %c0_i32 = arith.constant 0 : i32
    %c0_i32_0 = arith.constant 0 : i32
    return %arg1, %c0_i32 : i32, i32
  }
  func.func @transform_2(%arg0: i32, %arg1: i32) -> (i32, i32) {
    %c0_i32 = arith.constant 0 : i32
    %c0_i32_0 = arith.constant 0 : i32
    %c0_i32_1 = arith.constant 0 : i32
    return %c0_i32, %c0_i32_0 : i32, i32
  }
  func.func @transform_3(%arg0: i32, %arg1: i32) -> (i32, i32, i32) {
    %c0_i32 = arith.constant 0 : i32
    %c0_i32_0 = arith.constant 0 : i32
    return %arg0, %arg1, %c0_i32 : i32, i32, i32
  }
  func.func @transform_4(%arg0: i32, %arg1: i32) -> (i32, i32, i32) {
    %c0_i32 = arith.constant 0 : i32
    %c0_i32_0 = arith.constant 0 : i32
    return %arg0, %arg1, %c0_i32 : i32, i32, i32
  }
}

</mosaic_0001>

<bundles_post_ra>
// kernel: tpu_custom_call.1
= control target key start
LH: loop header
LB: loop body
LE: loop exit
PB: predicated region body
PF: predicated region fallthrough
CT: control target
= control target key end

     0   :  { %9 = vsyncpa [#allocation3], 0  ;;  %s1247_s0 = inlined_call_operand.vmem [shape: f32[4,9], index: 0, kind: input, shape index: {}]   ;;  %s1248_s1 = inlined_call_operand.vmem [shape: f32[4,1], index: 1, kind: input, shape index: {}]   ;;  %s1249_s2 = inlined_call_operand.hbm [shape: f32[9,256], index: 2, kind: input, shape index: {}]   ;;  %s1250_s3 = inlined_call_operand.hbm [shape: f32[2,4,256], index: 3, kind: input, shape index: {}]   ;;  %s1251_s4 = inlined_call_operand.hbm [shape: f32[2,4,256], index: 4, kind: output, shape index: {}]  }
   0x1   :  { %10 = vsyncpa [#allocation6], 0 }
   0x2   :  { %12 = vsyncpa [#allocation6 + $0x1], 0 }
   0x3   :  { %13 = vsyncpa [#allocation4], 0 }
   0x4   :  { %15 = vsyncpa [#allocation4 + $0x1], 0  ;;  %s1030_s15 = smov 0   ;;  %s1032_s16 = smov 0  }
   0x5   :  { %s1034_s17 = smov 0   ;;  %s1036_s18 = smov 0  }
   0x6   :  { %s1038_s19 = smov 0   ;;  %s1040_s20 = smov 0  }
   0x7 LB: > { %s711_s21 = sadd.s32 4294967295, %s982_s20   ;;  %p713_p0 = scmp.ge.s32.totalorder %s982_s20, 1  ;;  %s982_s20 = sphi %s1040_s20, %s21_s20   ;;  %s978_s19 = sphi %s1038_s19, %s1262_s19   ;;  %s974_s18 = sphi %s1036_s18, %s1261_s18   ;;  %s970_s17 = sphi %s1034_s17, %s1260_s17   ;;  %s966_s16 = sphi %s1032_s16, %s1259_s16   ;;  %s962_s15 = sphi %s1030_s15, %s1258_s15  }
   0x8   : > { %p1062_p1 = scmp.eq.s32.totalorder %s711_s21, 0  ;;  %p167_p2 = scmp.lt.s32.totalorder %s982_s20, 3 }
   0x9   : > { %s192_s25 = sshll.u32 %s1249_s2, 4  ;;  %s984_s27 = smov [#allocation2]   ;;  %s193_s25 = int_to_ptr.hbm [resolvable:$true] %s192_s25 }
   0xa   : > { %p1070_p3 = pnand %p713_p0, %p167_p2  ;;  %s194_s28 = sshll.u32 %s984_s27, 4  ;;  %s195_s28 = int_to_ptr.vmem [resolvable:$true] %s194_s28 }
   0xb   : > { %p717_p6 = scmp.ge.s32.totalorder %s982_s20, 2  ;;  %s985_s29 = smov 256  }
   0xc   : > { %p740_p4 = pneg %p1070_p3  ;;  %s986_s30 = smov 16  }
   0xd   : > { %s712_s5 = sadd.s32 4294967294, %s982_s20   ;;  %s33_s6 = sadd.s32 1, %s978_s19 }
   0xe   : > { %p741_p5 = pnand %p740_p4, %p1062_p1  ;;  %s115_s7 = sadd.s32 1, %s970_s17 }
   0xf   : > { %p35_p7 = scmp.ge.s32.totalorder %s33_s6, 2  ;;  %p122_p8 = scmp.ne.s32.totalorder %s970_s17, %s966_s16 }
  0x10   : > { %743 = dma.hbm_to_vmem [thread:$0]  (!%p741_p5), %s193_s25, 512, %s195_s28, [#allocation3], %s985_s29, %s985_s29, %s986_s30  }
  0x11   : > { %p123_p9 = scmp.eq.s32.totalorder %s982_s20, 0  ;;  %p128_p10 = scmp.ne.s32.totalorder %s966_s16, %s962_s15 }
  0x12   : > { %s1264_s6 = smov (%p35_p7, %s33_s6), 0  ;;  %p154_p13 = scmp.eq.s32.totalorder %s711_s21, 1 }
  0x13   : > { %p1089_p11 = por %p123_p9, %p122_p8  ;;  %p1095_p12 = por %p1062_p1, %p128_p10 }
  0x14   : > { %s110_s10 = ssub.s32 %s978_s19, %s1264_s6  ;;  %p160_p2 = scmp.eq.s32.totalorder %s712_s5, 1 }
  0x15   : > { %p113_p0 = scmp.eq.s32.totalorder %s110_s10, 0  ;;  %p1101_p4 = por %p154_p13, %p122_p8 }
  0x16   : > { %p753_p5 = scmp.lt.s32.totalorder %s982_s20, 2  ;;  %p1109_p7 = por %p160_p2, %p128_p10 }
  0x17   : > { %s1107_s12 = scalar_select %p113_p0, %s970_s17, %s115_s7  }
  0x18   : > { %s208_s14 = sand.u32 1, %s970_s17   ;;  %s730_s24 = sshll.u32 %s978_s19, 3 }
  0x19   : > { %s718_s23 = sshll.u32 %s208_s14, 3  ;;  %s219_s21 = scalar_lea.hbm %s1250_s3, %s730_s24 }
  0x1a   : > { %s212_s28 = scalar_lea.vmem [#allocation5], %s718_s23  ;;  %s221_s30 = sshll.u32 %s219_s21, 4  ;;  %s222_s30 = int_to_ptr.hbm [resolvable:$true] %s221_s30 }
  0x1b   : > { %s223_s29 = sshll.u32 %s212_s28, 4  ;;  %p745_p8 = pnand %p753_p5, %p1089_p11  ;;  %s224_s29 = int_to_ptr.vmem [resolvable:$true] %s223_s29 }
  0x1c   : > { %s209_s5 = scalar_lea.sflag [#allocation6], %s208_s14  ;;  %232 = sbr.rel (%p1070_p3) target bundleno = 327 (0x147), region = 36 }
  0x1d   : > { %747 = dma.hbm_to_vmem [thread:$0]  (!%p745_p8), %s222_s30, 128, %s224_s29, %s209_s5  }
  0x21   : > { %949 = dma.done.wait (%p1062_p1), [#allocation3], 512  }
  0x22   : > { %951 = vsyncadd (%p1062_p1), [#allocation3], 4294966784  ;;  %s1127_s7 = sand.u32 1, %s966_s16  }
  0x23   : > { %s723_s8 = sshll.u32 %s1127_s7, 3  ;;  %s240_s10 = scalar_lea.sflag [#allocation6], %s1127_s7 }
  0x24   : > { %s243_s14 = scalar_lea.vmem [#allocation5], %s723_s8 }
  0x25   : > { %953 = dma.done.wait (%p1095_p12), %s240_s10, 128  }
  0x26   : > { %955 = vsyncadd (%p1095_p12), %s240_s10, 4294967168  ;;  %v987_v0 = vmov 4   ;;  %v988_v1 = vmov 5   ;;  %v989_v2 = vmov 0   ;;  %v1140_v3 = vld [vmem:[%s1247_s0] sm:$0xf]  ;;  %v306_v53 = vlaneseq }
  0x27   : > { %825 = vset.pattern.permute.xlu0 %v987_v0  ;;  %831 = vset.pattern.permute.xlu1 %v988_v1  ;;  %v1142_v4 = vld [vmem:[%s243_s14] sm:$0xff]  ;;  %v290_v5 = vld [vmem:[%s1248_s1] sm:$0xf]  ;;  %s990_s24 = smov 17   ;;  %v991_v10 = vmov 1   ;;  %s992_s25 = smov 15  }
  0x28   : > { %827 = vset.pattern.permute.xlu2 %v989_v2  ;;  %426 = vperm.xlu0 %825, %v1140_v3   ;;  %297 = vst [vmem:[#allocation1] ss:$2 sm:$0xff] %v1142_v4  ;;  %v993_v13 = vmov 2   ;;  %s994_s27 = smov 16   ;;  %s995_s21 = smov 1   ;;  %v996_v15 = vmov 3  }
  0x29   : > { %321 = vperm.xlu2 %827, %v1140_v3   ;;  %v997_v17 = vmov 6   ;;  %v416_v18 = vld [vmem:[#allocation2 + $0x4] ss:$8 sm:$0x3]  ;;  %vm421_vm0 = vcmask 1043456   ;;  %v999_v30 = vmov 7  }
  0x2a   : > { %v419_v19 = vperm.slane %v416_v18, 1  ;;  %v418_v20 = vperm.slane %v416_v18, 0  ;;  %v998_v22 = vmov 839922192   ;;  %s1000_s28 = smov 127   ;;  %v1001_v35 = vmov 8  }
  0x2b   : > { %v429_v23 = vunpack.c.l.s4 %v998_v22  ;;  %s1002_s29 = smov 113   ;;  %s1003_s30 = smov 112   ;;  %v1172_v54 = vand.u32 127, %v306_v53  ;;  %v311_v56 = vld [vmem:[#allocation2] ss:$8 sm:$0x3] }
  0x2c   : > { %v420_v21 = vrot.slane %v419_v19, 4  ;;  %s1004_s5 = smov 111   ;;  %v314_v59 = vperm.slane %v311_v56, 1  ;;  %v341_v61 = vld [vmem:[#allocation2 + $0x1] ss:$8 sm:$0x3] }
  0x2d   : > { %v430_v25 = vunpack.c.0.s8 %v429_v23  ;;  %vm308_vm1 = vcmp.lt.s32.totalorder %v1172_v54, 17  ;;  %v313_v62 = vperm.slane %v311_v56, 0  ;;  %vm337_vm2 = vcmp.lt.s32.totalorder %v1172_v54, 16  ;;  %s731_s10 = sshll.u32 %s974_s18, 3  ;;  %s276_s18 = scalar_lea.vmem [#allocation7], %s723_s8 }
  0x2e   : > { %v422_v24 = vsel %vm421_vm0, %v418_v20, %v420_v21  ;;  %vm366_vm3 = vcmp.lt.s32.totalorder %v1172_v54, 15  ;;  %vm395_vm4 = vcmp.lt.s32.totalorder %v1172_v54, 1  ;;  %vm451_vm5 = vcmp.lt.s32.totalorder %v1172_v54, 127  ;;  %s580_s26 = scalar_lea.hbm %s1251_s4, %s731_s10  ;;  %s582_s9 = sshll.u32 %s276_s18, 4  ;;  %s583_s9 = int_to_ptr.vmem [resolvable:$true] %s582_s9 }
  0x2f   : > { %v298_v6 = vld.sshfl [vmem:[#allocation1] sm:$0xff pattern:$0x75316420]  ;;  %v299_v7 = vld.sshfl [vmem:[#allocation1 + $0x8] sm:$0xff pattern:$0x75316420]  ;;  %v424_v26 = vmul.f32 %v422_v24, %v1142_v4 }
  0x30   : > { %302 = vrot.lane.b32.xlu1 %v298_v6, %s990_s24  ;;  %328 = vst [vmem:[#allocation1] ss:$2 sm:$0xff] %v1142_v4  ;;  %826 = vset.pattern.permute.xlu0 %v989_v2  ;;  %v344_v2 = vperm.slane %v341_v61, 1  ;;  %v343_v6 = vperm.slane %v341_v61, 0  ;;  %vm480_vm6 = vcmp.lt.s32.totalorder %v1172_v54, 113  ;;  %vm509_vm7 = vcmp.lt.s32.totalorder %v1172_v54, 112 }
  0x31   : > { %293 = vperm.xlu0 %826, %v290_v5   ;;  %828 = vset.pattern.permute.xlu2 %v991_v10  ;;  %vm538_vm8 = vcmp.lt.s32.totalorder %v1172_v54, 111  ;;  %s584_s23 = sshll.u32 %s580_s26, 4  ;;  %s916_s8 = scalar_lea.hbm %s1251_s4, 16  ;;  %s585_s23 = int_to_ptr.hbm [resolvable:$true] %s584_s23 }
  0x32   : > { %350 = vperm.xlu2 %828, %v1140_v3  }
  0x37   : > { %v330_v8 = vld.sshfl [vmem:[#allocation1 + $0x8] sm:$0xff pattern:$0x75316420]  ;;  %v329_v9 = vld.sshfl [vmem:[#allocation1] sm:$0xff pattern:$0x75316420] }
  0x38   : > { %304 = vrot.lane.b32.xlu1 %v299_v7, %s990_s24  ;;  %357 = vst [vmem:[#allocation1] ss:$2 sm:$0xff] %v1142_v4  ;;  %s567_s24 = scalar_lea.sflag [#allocation4], %s1127_s7 }
  0x39   : > { %835 = vset.pattern.permute.xlu0 %v1001_v35 }
  0x3a   : > { %829 = vset.pattern.permute.xlu2 %v993_v13 }
  0x3b   : > { %379 = vperm.xlu2 %829, %v1140_v3  }
  0x3f   : > { %v359_v11 = vld.sshfl [vmem:[#allocation1 + $0x8] sm:$0xff pattern:$0x75316420]  ;;  %v358_v12 = vld.sshfl [vmem:[#allocation1] sm:$0xff pattern:$0x75316420] }
  0x40   : > { %464 = vperm.xlu1 %831, %v1140_v3   ;;  %362 = vrot.lane.b32.xlu0 %v358_v12, %s992_s25  ;;  %386 = vst [vmem:[#allocation1] ss:$2 sm:$0xff] %v1142_v4 }
  0x43   : > { %333 = vrot.lane.b32.xlu2 %v329_v9, %s994_s27 }
  0x44   : > { %830 = vset.pattern.permute.xlu2 %v996_v15 }
  0x47   : > { %v387_v14 = vld.sshfl [vmem:[#allocation1] sm:$0xff pattern:$0x75316420]  ;;  %v388_v16 = vld.sshfl [vmem:[#allocation1 + $0x8] sm:$0xff pattern:$0x75316420] }
  0x48   : > { %335 = vrot.lane.b32.xlu1 %v330_v8, %s994_s27  ;;  %391 = vrot.lane.b32.xlu0 %v387_v14, %s995_s21  ;;  %v399_v14 = vld [vmem:[#allocation2 + $0x3] ss:$8 sm:$0x3] }
  0x49   : > { %832 = vset.pattern.permute.xlu1 %v997_v17  ;;  %v402_v22 = vperm.slane %v399_v14, 1 }
  0x4b   : > { %408 = vperm.xlu2 %830, %v1140_v3  }
  0x50   : > { %364 = vrot.lane.b32.xlu1 %v359_v11, %s992_s25  ;;  %s910_s25 = sshra.s32 %s585_s23, 4  ;;  %s911_s25 = int_to_ptr.hbm [resolvable:$true] %s910_s25 }
  0x51   : > { %s912_s27 = scalar_lea.hbm %s911_s25, 8  ;;  %p917_p10 = scmp.lt.s32.totalorder %s911_s25, %s1251_s4 }
  0x52   : > { %p913_p1 = scmp.ne.s32.totalorder %s911_s25, %s912_s27  ;;  %p918_p11 = scmp.lt.s32.totalorder %s916_s8, %s912_s27 }
  0x53   : > { %834 = vset.pattern.permute.xlu2 %v1001_v35 }
  0x54   : > { %p914_p3 = pnand %p913_p1, %p1101_p4  ;;  %p919_p12 = por %p918_p11, %p917_p10 }
  0x56   : > { %p915_p9 = pneg %p914_p3 }
  0x58   : > { %393 = vrot.lane.b32.xlu1 %v388_v16, %s995_s21  ;;  %p920_p13 = pnand %p919_p12, %p915_p9 }
  0x60   : > { %493 = vperm.xlu1 %832, %v1140_v3  }
  0x68   : > { %833 = vset.pattern.permute.xlu1 %v999_v30 }
  0x83   : > { %v322_v43 = vpop.permute.xlu2 %321 }
  0x8c   : > { %v351_v45 = vpop.permute.xlu2 %350 }
  0x95   : > { %v380_v47 = vpop.permute.xlu2 %379 }
  0x9a   : > { %v427_v27 = vpop.permute.xlu0 %426 }
  0x9b   : > { %v431_v28 = vperm.slane %v427_v27, %v430_v25 }
  0x9d   : > { %v433_v29 = vmul.f32 %v431_v28, %v424_v26  ;;  %v334_v50 = vpop.permute.xlu2 %333  ;;  %v401_v28 = vperm.slane %v399_v14, 0 }
  0x9f   : > { %435 = vst [vmem:[#allocation1] ss:$2 sm:$0xff] %v433_v29 }
  0xa2   : > { %v303_v42 = vpop.permute.xlu1 %302 }
  0xa3   : > { %v294_v48 = vpop.permute.xlu0 %293 }
  0xa5   : > { %v1174_v55 = vpop.permute.xlu2 %408 }
  0xa6   : > { %v1160_v31 = vld.sshfl [vmem:[#allocation1] sm:$0xff pattern:$0x75316420]  ;;  %v1162_v32 = vld.sshfl [vmem:[#allocation1 + $0x8] sm:$0xff pattern:$0x75316420] }
  0xa7   : > { %442 = vst [vmem:[#allocation1] ss:$2 sm:$0xff] %v1142_v4 }
  0xaa   : > { %v305_v44 = vpop.permute.xlu1 %304 }
  0xab   : > { %v309_v60 = vsel %vm308_vm1, %v303_v42, %v305_v44  ;;  %v310_v0 = vsel %vm308_vm1, %v305_v44, %v303_v42 }
  0xac   : > { %v318_v1 = vmul.f32 %v314_v59, %v309_v60  ;;  %v317_v5 = vmul.f32 %v313_v62, %v310_v0 }
  0xae   : > { %v444_v33 = vld.sshfl [vmem:[#allocation1 + $0x8] sm:$0xff pattern:$0x75316420]  ;;  %v443_v34 = vld.sshfl [vmem:[#allocation1] sm:$0xff pattern:$0x75316420]  ;;  %v325_v10 = vmul.f32 %v322_v43, %v318_v1  ;;  %v324_v15 = vmul.f32 %v322_v43, %v317_v5 }
  0xaf   : > { %449 = vrot.lane.b32.xlu1 %v444_v33, %s1000_s28  ;;  %447 = vrot.lane.b32.xlu0 %v443_v34, %s1000_s28  ;;  %471 = vst [vmem:[#allocation1] ss:$2 sm:$0xff] %v1142_v4  ;;  %v542_v5 = vld [vmem:[#allocation2 + $0x10] ss:$8 sm:$0x3] }
  0xb0   : > { %v327_v19 = vadd.f32 %v325_v10, %v294_v48  ;;  %v326_v25 = vadd.f32 %v324_v15, %v294_v48  ;;  %v544_v14 = vperm.slane %v542_v5, 0  ;;  %v545_v15 = vperm.slane %v542_v5, 1 }
  0xb2   : > { %v1170_v46 = vpop.permute.xlu1 %464  ;;  %v363_v52 = vpop.permute.xlu0 %362 }
  0xb6   : > { %v473_v36 = vld.sshfl [vmem:[#allocation1 + $0x8] sm:$0xff pattern:$0x75316420]  ;;  %v472_v37 = vld.sshfl [vmem:[#allocation1] sm:$0xff pattern:$0x75316420] }
  0xb7   : > { %478 = vrot.lane.b32.xlu0 %v473_v36, %s1002_s29  ;;  %500 = vst [vmem:[#allocation1] ss:$2 sm:$0xff] %v1142_v4  ;;  %522 = vperm.xlu1 %833, %v1140_v3   ;;  %v455_v36 = vld [vmem:[#allocation2 + $0x5] ss:$8 sm:$0x3] }
  0xb8   : > { %476 = vrot.lane.b32.xlu2 %v472_v37, %s1002_s29  ;;  %v458_v42 = vperm.slane %v455_v36, 1 }
  0xba   : > { %v336_v49 = vpop.permute.xlu1 %335  ;;  %v392_v58 = vpop.permute.xlu0 %391 }
  0xbb   : > { %v339_v7 = vsel %vm337_vm2, %v336_v49, %v334_v50 }
  0xbc   : > { %v347_v17 = vmul.f32 %v343_v6, %v339_v7 }
  0xbe   : > { %v501_v38 = vld.sshfl [vmem:[#allocation1] sm:$0xff pattern:$0x75316420]  ;;  %v502_v39 = vld.sshfl [vmem:[#allocation1 + $0x8] sm:$0xff pattern:$0x75316420]  ;;  %v353_v27 = vmul.f32 %v351_v45, %v347_v17 }
  0xbf   : > { %507 = vrot.lane.b32.xlu0 %v502_v39, %s1003_s30  ;;  %529 = vst [vmem:[#allocation1] ss:$2 sm:$0xff] %v1142_v4  ;;  %v338_v4 = vsel %vm337_vm2, %v334_v50, %v336_v49  ;;  %v513_v49 = vld [vmem:[#allocation2 + $0x7] ss:$8 sm:$0x3] }
  0xc0   : > { %505 = vrot.lane.b32.xlu2 %v501_v38, %s1003_s30  ;;  %v348_v12 = vmul.f32 %v344_v2, %v338_v4  ;;  %v355_v39 = vadd.f32 %v353_v27, %v326_v25  ;;  %v516_v60 = vperm.slane %v513_v49, 1 }
  0xc2   : > { %v365_v51 = vpop.permute.xlu1 %364  ;;  %v354_v21 = vmul.f32 %v351_v45, %v348_v12  ;;  %v457_v45 = vperm.slane %v455_v36, 0 }
  0xc3   : > { %v367_v13 = vsel %vm366_vm3, %v363_v52, %v365_v51  ;;  %v368_v18 = vsel %vm366_vm3, %v365_v51, %v363_v52 }
  0xc4   : > { %v356_v34 = vadd.f32 %v354_v21, %v327_v19 }
  0xc6   : > { %v531_v40 = vld.sshfl [vmem:[#allocation1 + $0x8] sm:$0xff pattern:$0x75316420]  ;;  %v530_v41 = vld.sshfl [vmem:[#allocation1] sm:$0xff pattern:$0x75316420] }
  0xc7   : > { %536 = vrot.lane.b32.xlu0 %v531_v40, %s1004_s5 }
  0xc8   : > { %534 = vrot.lane.b32.xlu2 %v530_v41, %s1004_s5  ;;  %v484_v41 = vld [vmem:[#allocation2 + $0x6] ss:$8 sm:$0x3] }
  0xc9   : > { %v487_v51 = vperm.slane %v484_v41, 1 }
  0xca   : > { %v394_v57 = vpop.permute.xlu1 %393 }
  0xcb   : > { %v396_v24 = vsel %vm395_vm4, %v392_v58, %v394_v57  ;;  %v397_v29 = vsel %vm395_vm4, %v394_v57, %v392_v58  ;;  %v486_v58 = vperm.slane %v484_v41, 0 }
  0xcc   : > { %v406_v35 = vmul.f32 %v402_v22, %v396_v24  ;;  %v405_v40 = vmul.f32 %v401_v28, %v397_v29 }
  0xce   : > { %v412_v44 = vmul.f32 %v1174_v55, %v406_v35  ;;  %v411_v53 = vmul.f32 %v1174_v55, %v405_v40  ;;  %v515_v55 = vperm.slane %v513_v49, 0 }
  0xd0   : > { %551 = vperm.xlu2 %834, %v1140_v3   ;;  %v370_v3 = vld [vmem:[#allocation2 + $0x2] ss:$8 sm:$0x3] }
  0xd1   : > { %v373_v11 = vperm.slane %v370_v3, 1  ;;  %v372_v16 = vperm.slane %v370_v3, 0 }
  0xd2   : > { %v1181_v8 = vpop.permute.xlu1 %493 }
  0xd3   : > { %v377_v20 = vmul.f32 %v373_v11, %v367_v13  ;;  %v376_v26 = vmul.f32 %v372_v16, %v368_v18 }
  0xd5   : > { %v383_v33 = vmul.f32 %v380_v47, %v377_v20  ;;  %v382_v38 = vmul.f32 %v380_v47, %v376_v26 }
  0xd7   : > { %v385_v43 = vadd.f32 %v383_v33, %v356_v34  ;;  %v384_v52 = vadd.f32 %v382_v38, %v355_v39 }
  0xd9   : > { %v414_v61 = vadd.f32 %v412_v44, %v385_v43  ;;  %v413_v3 = vadd.f32 %v411_v53, %v384_v52 }
  0xdb   : > { %v441_v10 = vadd.f32 %v1162_v32, %v414_v61  ;;  %v440_v16 = vadd.f32 %v1160_v31, %v413_v3 }
 0x112   : > { %v1178_v63 = vpop.permute.xlu2 %476 }
 0x11a   : > { %v506_v23 = vpop.permute.xlu2 %505 }
 0x121   : > { %v448_v9 = vpop.permute.xlu0 %447  ;;  %v450_v37 = vpop.permute.xlu1 %449 }
 0x122   : > { %v453_v48 = vsel %vm451_vm5, %v450_v37, %v448_v9  ;;  %v452_v50 = vsel %vm451_vm5, %v448_v9, %v450_v37  ;;  %v535_v56 = vpop.permute.xlu2 %534 }
 0x123   : > { %v462_v57 = vmul.f32 %v458_v42, %v453_v48  ;;  %v461_v62 = vmul.f32 %v457_v45, %v452_v50 }
 0x125   : > { %v468_v6 = vmul.f32 %v1170_v46, %v462_v57  ;;  %v467_v11 = vmul.f32 %v1170_v46, %v461_v62 }
 0x127   : > { %v470_v18 = vadd.f32 %v468_v6, %v441_v10  ;;  %v469_v32 = vadd.f32 %v467_v11, %v440_v16 }
 0x129   : > { %v479_v30 = vpop.permute.xlu0 %478 }
 0x12a   : > { %v482_v47 = vsel %vm480_vm6, %v479_v30, %v1178_v63  ;;  %v481_v0 = vsel %vm480_vm6, %v1178_v63, %v479_v30  ;;  %v523_v63 = vpop.permute.xlu1 %522  ;;  %v552_v22 = vpop.permute.xlu2 %551 }
 0x12b   : > { %v491_v2 = vmul.f32 %v487_v51, %v482_v47  ;;  %v490_v7 = vmul.f32 %v486_v58, %v481_v0 }
 0x12d   : > { %v497_v12 = vmul.f32 %v1181_v8, %v491_v2  ;;  %v496_v17 = vmul.f32 %v1181_v8, %v490_v7 }
 0x12f   : > { %v498_v31 = vadd.f32 %v496_v17, %v469_v32 }
 0x131   : > { %v508_v59 = vpop.permute.xlu0 %507 }
 0x132   : > { %v511_v1 = vsel %vm509_vm7, %v508_v59, %v506_v23  ;;  %v510_v4 = vsel %vm509_vm7, %v506_v23, %v508_v59  ;;  %v499_v23 = vadd.f32 %v497_v12, %v470_v18 }
 0x133   : > { %v520_v9 = vmul.f32 %v516_v60, %v511_v1  ;;  %v519_v13 = vmul.f32 %v515_v55, %v510_v4 }
 0x135   : > { %v526_v19 = vmul.f32 %v523_v63, %v520_v9  ;;  %v525_v54 = vmul.f32 %v523_v63, %v519_v13 }
 0x137   : > { %v528_v8 = vadd.f32 %v526_v19, %v499_v23  ;;  %v527_v28 = vadd.f32 %v525_v54, %v498_v31 }
 0x139   : > { %v537_v20 = vpop.permute.xlu0 %536 }
 0x13a   : > { %v539_v21 = vsel %vm538_vm8, %v535_v56, %v537_v20  ;;  %v540_v46 = vsel %vm538_vm8, %v537_v20, %v535_v56 }
 0x13b   : > { %v548_v24 = vmul.f32 %v544_v14, %v539_v21  ;;  %v549_v25 = vmul.f32 %v545_v15, %v540_v46 }
 0x13d   : > { %v554_v26 = vmul.f32 %v552_v22, %v548_v24  ;;  %v555_v27 = vmul.f32 %v552_v22, %v549_v25 }
 0x13f   : > { %v557_v29 = vadd.f32 %v555_v27, %v528_v8  ;;  %v556_v30 = vadd.f32 %v554_v26, %v527_v28 }
 0x141   : > { %v560_v33 = vrot.slane %v557_v29, 4 }
 0x143   : > { %v561_v34 = vsel %vm421_vm0, %v556_v30, %v560_v33 }
 0x144   : > { %565 = vst [vmem:[%s276_s18] sm:$0xff] %v561_v34 }
 0x145   : > { %923 = shalt.err (!%p920_p13)
}
 0x146   : > { %738 = dma.vmem_to_hbm [thread:$0]  (%p1101_p4), %s583_s9, 128, %s585_s23, %s567_s24  }
 0x147 PF: > { %s596_s7 = sand.u32 1, %s962_s15   ;;  %p749_p0 = pnand %p717_p6, %p1109_p7 }
 0x148   : > { %s597_s5 = scalar_lea.sflag [#allocation4], %s596_s7 }
 0x149   : > { %p750_p2 = pneg %p749_p0 }
 0x14b   : > { %957 = dma.done.wait (%p750_p2), %s597_s5, 128  }
 0x14c   : > { %959 = vsyncadd (%p750_p2), %s597_s5, 4294967168  ;;  %s21_s20 = sadd.s32 1, %s982_s20   ;;  %s1258_s15 = smov %s966_s16 }
 0x14d   : > { %p18_p5 = scmp.ge.s32.totalorder %s21_s20, 4   ;;  %s1259_s16 = smov %s970_s17 }
 0x14e   : > { %s1260_s17 = smov %s1107_s12  ;;  %s1261_s18 = smov %s978_s19 }
 0x14f   : > { %s1262_s19 = smov %s1264_s6  ;;  %20 = sbr.rel (!%p18_p5) target bundleno = 7 (0x7), region = 102 }
 0x154   :  { %603 = vsyncpa [#allocation3], 1 }
 0x155   :  { %605 = vsyncpa [#allocation3 + $0x1], 1 }
 0x156   :  { %606 = vsyncpa [#allocation6], 1 }
 0x157   :  { %608 = vsyncpa [#allocation6 + $0x1], 1 }
 0x158   :  { %609 = vsyncpa [#allocation4], 1 }
 0x159   :  { %611 = vsyncpa [#allocation4 + $0x1], 1 }

</bundles_post_ra>
